<compile_context>
chip_gen: v5e
topology: v5e:2x2
jax: 0.10.0
libtpu: 0.0.40
codegen_flags: <defaults>
</compile_context>

<pallas_src>
import jax
import jax.numpy as jnp
from jax.experimental import pallas as pl
from jax.experimental.pallas import tpu as pltpu


# ---- packed-parameter slab layout (rows; lane width = 24) -------------------
_HID = 24        # fc2 width == slab lane width
_W1_ROW = 0      # W1 rows 0:in_features, b1 at row in_features (section 0:8)
_W2_ROW = 8      # W2 rows 8:32
_B2_ROW = 32     # b2 row 32, b35 row 33, b46 row 34 (section 32:40)
_B35_ROW = 33
_B46_ROW = 34
_W35_ROW = 40    # fused [W3 | W5] rows 40:64
_W46_ROW = 64    # fused output weights rows 64:88 (value column replicated)
_SLAB_ROWS = 88


def dueling_kernel(x_ref, p_ref, o_ref):
    TB, K = x_ref.shape             # K = in_features (static)
    A = o_ref.shape[1]              # out_features (advantage width)
    x = x_ref[...]

    # fc1 + relu on the MXU ([TB,2]@[2,24]); the vex slot is idle otherwise.
    w1 = p_ref[_W1_ROW:_W1_ROW + K, :]
    b1 = p_ref[_W1_ROW + K:_W1_ROW + K + 1, :]
    h = jnp.maximum(
        jnp.dot(x, w1, preferred_element_type=jnp.float32) + b1, 0.0)

    # fc2 + relu
    w2 = p_ref[_W2_ROW:_W2_ROW + _HID, :]
    b2 = p_ref[_B2_ROW:_B2_ROW + 1, :]
    h = jnp.maximum(
        jnp.dot(h, w2, preferred_element_type=jnp.float32) + b2, 0.0)

    # fused branch layer: [relu(h@W3+b3) | relu(h@W5+b5)] in one matmul
    w35 = p_ref[_W35_ROW:_W35_ROW + _HID, :]
    b35 = p_ref[_B35_ROW:_B35_ROW + 1, :]
    hv = jnp.maximum(
        jnp.dot(h, w35, preferred_element_type=jnp.float32) + b35, 0.0)

    # fused output layer: W46 has W4 in lanes 0:A (rows 0:12) and W6 replicated
    # into lanes 0:A (rows 12:24); b46[:, 0:A] = b4 + b6.  So av[:, 0:A] is
    # already a + v — no value lane-broadcast, no extra add on the serial tail.
    w46 = p_ref[_W46_ROW:_W46_ROW + _HID, :]
    b46 = p_ref[_B46_ROW:_B46_ROW + 1, :]
    av = jnp.dot(hv, w46, preferred_element_type=jnp.float32) + b46

    o_ref[...] = av[:, 0:A]


def pack_params(p, in_features=2, out_features=4):
    """Pack all layer weights/biases into one f32 slab [88, 24].

    Weights are stored [in, out]; branch layers are fused:
      W35 = [W3 | W5]                       (lanes 0:12 advantage, 12:24 value)
      W46 = [W4 in rows 0:12 | W6 replicated into rows 12:24], lanes 0:A
      b46[:, 0:A] = b4 + b6
    so the final matmul directly yields a + v in lanes 0:A.
    """
    H = _HID
    A = out_features

    def pad_rows(a, n):
        return jnp.pad(a, ((0, n - a.shape[0]), (0, 0)))

    sec0 = pad_rows(jnp.concatenate([p["w1"], p["b1"]], axis=0), _W2_ROW)  # 0:8
    w2 = p["w2"]                                                           # 8:32
    b35 = jnp.concatenate([p["b3"], p["b5"]], axis=1)                      # [1,24]
    b46 = jnp.zeros((1, H), jnp.float32).at[:, 0:A].set(p["b4"] + p["b6"])
    sec_b = pad_rows(jnp.concatenate([p["b2"], b35, b46], axis=0),
                     _W35_ROW - _B2_ROW)                                   # 32:40
    w35 = jnp.concatenate([p["w3"], p["w5"]], axis=1)                      # 40:64
    w46 = jnp.zeros((H, H), jnp.float32)
    w46 = w46.at[0:12, 0:A].set(p["w4"])
    w46 = w46.at[12:24, 0:A].set(jnp.broadcast_to(p["w6"], (12, A)))       # 64:88

    slab = jnp.concatenate([sec0, w2, sec_b, w35, w46], axis=0)
    assert slab.shape == (_SLAB_ROWS, H)
    # TODO(synk): on v6e/v7x at large batch, store the weight sections as bf16
    # (keep preferred_element_type=f32) to halve slab bytes and hit the bf16
    # MXU rate; negligible at these sizes, so kept f32 for exactness.
    return slab.astype(jnp.float32)


def dueling_net_forward(x, slab, out_features=4, batch_tile=512):
    """x: [B, in_features] f32; slab: packed params from pack_params()."""
    B, K = x.shape
    TB = min(B, batch_tile)           # large batch tiles; 3 dependent matmuls/step
    grid = (pl.cdiv(B, TB),)
    return pl.pallas_call(
        dueling_kernel,
        out_shape=jax.ShapeDtypeStruct((B, out_features), jnp.float32),
        grid=grid,
        in_specs=[
            pl.BlockSpec((TB, K), lambda i: (i, 0)),
            # Constant block index -> slab stays VMEM-resident across steps.
            pl.BlockSpec(slab.shape, lambda i: (0, 0)),
        ],
        out_specs=pl.BlockSpec((TB, out_features), lambda i: (i, 0)),
        compiler_params=pltpu.CompilerParams(
            dimension_semantics=("parallel",)),   # dual-TC sharding on v7x
    )(x, slab)
    # TODO(synk): for RL serving, amortize launch overhead by batching many env
    # states per call (or iterating timesteps inside one pallas_call) — at B=8
    # the call is launch-overhead/DMA-setup bound, not compute bound.


def init_params(key, in_features=2, out_features=4):
    """Deterministic init mimicking PyTorch's default U(-1/sqrt(fan_in), ...).

    Weights are stored as [in, out] (transposed vs. nn.Linear), biases [1, out].
    """
    sizes = {
        "1": (in_features, 24),
        "2": (24, 24),
        "3": (24, 12),
        "4": (12, out_features),
        "5": (24, 12),
        "6": (12, 1),
    }
    params = {}
    for name, (fan_in, fan_out) in sizes.items():
        key, kw, kb = jax.random.split(key, 3)
        bound = 1.0 / jnp.sqrt(jnp.float32(fan_in))
        params[f"w{name}"] = jax.random.uniform(
            kw, (fan_in, fan_out), jnp.float32, -bound, bound)
        params[f"b{name}"] = jax.random.uniform(
            kb, (1, fan_out), jnp.float32, -bound, bound)
    return params


def reference_forward(x, p):
    """Plain-JAX reference (unfused weights) for correctness checking."""
    h = jnp.maximum(x @ p["w1"] + p["b1"], 0.0)
    h = jnp.maximum(h @ p["w2"] + p["b2"], 0.0)
    a = jnp.maximum(h @ p["w3"] + p["b3"], 0.0)
    v = jnp.maximum(h @ p["w5"] + p["b5"], 0.0)
    a = a @ p["w4"] + p["b4"]
    v = v @ p["w6"] + p["b6"]
    return a + v


if __name__ == "__main__":
    key = jax.random.PRNGKey(0)
    key, kx, kx2 = jax.random.split(key, 3)

    B, in_features, out_features = 8, 2, 4
    x = jax.random.normal(kx, (B, in_features), jnp.float32)
    params = init_params(key, in_features=in_features, out_features=out_features)

    # One-time param packing (done outside the kernel call in real use).
    slab = pack_params(params, in_features=in_features, out_features=out_features)

    # Small-batch path (single grid step).
    out = dueling_net_forward(x, slab, out_features=out_features)
    out = jax.block_until_ready(out)
    ref = reference_forward(x, params)
    assert out.shape == (B, out_features)
    assert jnp.allclose(out, ref, atol=1e-5, rtol=1e-5), "mismatch vs reference"

    # Tiled / multi-step batch path (exercises the parallel batch grid axis).
    B2 = 64
    x2 = jax.random.normal(kx2, (B2, in_features), jnp.float32)
    out2 = dueling_net_forward(x2, slab, out_features=out_features, batch_tile=32)
    out2 = jax.block_until_ready(out2)
    ref2 = reference_forward(x2, params)
    assert out2.shape == (B2, out_features)
    assert jnp.allclose(out2, ref2, atol=1e-5, rtol=1e-5), "mismatch (tiled batch)"

    print("KERNEL_OK")
</pallas_src>

<mosaic_0001>
module attributes {stable_mosaic.version = 11 : i64} {
  func.func @dueling_kernel(%arg0: i32, %arg1: memref<8x2xf32, #tpu.memory_space<vmem>>, %arg2: memref<88x24xf32, #tpu.memory_space<vmem>>, %arg3: memref<8x4xf32, #tpu.memory_space<vmem>>) attributes {dimension_semantics = [#tpu.dimension_semantics<parallel>], iteration_bounds = array<i64: 1>, scalar_prefetch = 0 : i64, scratch_operands = 0 : i64, tpu.core_type = #tpu.core_type<tc>, window_params = [{transform_indices = @transform_0, window_bounds = array<i64: 8, 2>}, {pipeline_mode = #tpu.pipeline_mode<synchronous>, transform_indices = @transform_1, window_bounds = array<i64: 88, 24>}, {transform_indices = @transform_2, window_bounds = array<i64: 8, 4>}]} {
    %c0 = arith.constant 0 : index
    %c0_0 = arith.constant 0 : index
    %0 = vector.load %arg1[%c0, %c0_0] : memref<8x2xf32, #tpu.memory_space<vmem>>, vector<8x2xf32>
    %c0_1 = arith.constant 0 : index
    %c0_2 = arith.constant 0 : index
    %1 = vector.load %arg2[%c0_1, %c0_2] : memref<88x24xf32, #tpu.memory_space<vmem>>, vector<2x24xf32>
    %c2 = arith.constant 2 : index
    %c0_3 = arith.constant 0 : index
    %2 = vector.load %arg2[%c2, %c0_3] : memref<88x24xf32, #tpu.memory_space<vmem>>, vector<1x24xf32>
    %cst = arith.constant dense<0.000000e+00> : vector<8x24xf32>
    %3 = tpu.matmul %0, %1, %cst {dimension_numbers = #tpu.dot_dimension_numbers<[1], [0], [0], [1], [0, 0, 1, 1], [], []>} : vector<8x2xf32>, vector<2x24xf32>, vector<8x24xf32> -> vector<8x24xf32>
    %4 = vector.broadcast %2 : vector<1x24xf32> to vector<8x24xf32>
    %5 = arith.addf %3, %4 : vector<8x24xf32>
    %cst_4 = arith.constant 0.000000e+00 : f32
    %6 = vector.broadcast %cst_4 : f32 to vector<8x24xf32>
    %7 = arith.maximumf %5, %6 : vector<8x24xf32>
    %c8 = arith.constant 8 : index
    %c0_5 = arith.constant 0 : index
    %8 = vector.load %arg2[%c8, %c0_5] : memref<88x24xf32, #tpu.memory_space<vmem>>, vector<24x24xf32>
    %c32 = arith.constant 32 : index
    %c0_6 = arith.constant 0 : index
    %9 = vector.load %arg2[%c32, %c0_6] : memref<88x24xf32, #tpu.memory_space<vmem>>, vector<1x24xf32>
    %cst_7 = arith.constant dense<0.000000e+00> : vector<8x24xf32>
    %10 = tpu.matmul %7, %8, %cst_7 {dimension_numbers = #tpu.dot_dimension_numbers<[1], [0], [0], [1], [0, 0, 1, 1], [], []>} : vector<8x24xf32>, vector<24x24xf32>, vector<8x24xf32> -> vector<8x24xf32>
    %11 = vector.broadcast %9 : vector<1x24xf32> to vector<8x24xf32>
    %12 = arith.addf %10, %11 : vector<8x24xf32>
    %cst_8 = arith.constant 0.000000e+00 : f32
    %13 = vector.broadcast %cst_8 : f32 to vector<8x24xf32>
    %14 = arith.maximumf %12, %13 : vector<8x24xf32>
    %c40 = arith.constant 40 : index
    %c0_9 = arith.constant 0 : index
    %15 = vector.load %arg2[%c40, %c0_9] : memref<88x24xf32, #tpu.memory_space<vmem>>, vector<24x24xf32>
    %c33 = arith.constant 33 : index
    %c0_10 = arith.constant 0 : index
    %16 = vector.load %arg2[%c33, %c0_10] : memref<88x24xf32, #tpu.memory_space<vmem>>, vector<1x24xf32>
    %cst_11 = arith.constant dense<0.000000e+00> : vector<8x24xf32>
    %17 = tpu.matmul %14, %15, %cst_11 {dimension_numbers = #tpu.dot_dimension_numbers<[1], [0], [0], [1], [0, 0, 1, 1], [], []>} : vector<8x24xf32>, vector<24x24xf32>, vector<8x24xf32> -> vector<8x24xf32>
    %18 = vector.broadcast %16 : vector<1x24xf32> to vector<8x24xf32>
    %19 = arith.addf %17, %18 : vector<8x24xf32>
    %cst_12 = arith.constant 0.000000e+00 : f32
    %20 = vector.broadcast %cst_12 : f32 to vector<8x24xf32>
    %21 = arith.maximumf %19, %20 : vector<8x24xf32>
    %c64 = arith.constant 64 : index
    %c0_13 = arith.constant 0 : index
    %22 = vector.load %arg2[%c64, %c0_13] : memref<88x24xf32, #tpu.memory_space<vmem>>, vector<24x24xf32>
    %c34 = arith.constant 34 : index
    %c0_14 = arith.constant 0 : index
    %23 = vector.load %arg2[%c34, %c0_14] : memref<88x24xf32, #tpu.memory_space<vmem>>, vector<1x24xf32>
    %cst_15 = arith.constant dense<0.000000e+00> : vector<8x24xf32>
    %24 = tpu.matmul %21, %22, %cst_15 {dimension_numbers = #tpu.dot_dimension_numbers<[1], [0], [0], [1], [0, 0, 1, 1], [], []>} : vector<8x24xf32>, vector<24x24xf32>, vector<8x24xf32> -> vector<8x24xf32>
    %25 = vector.broadcast %23 : vector<1x24xf32> to vector<8x24xf32>
    %26 = arith.addf %24, %25 : vector<8x24xf32>
    %27 = vector.extract_strided_slice %26 {offsets = [0, 0], sizes = [8, 4], strides = [1, 1]} : vector<8x24xf32> to vector<8x4xf32>
    %c0_16 = arith.constant 0 : index
    %c0_17 = arith.constant 0 : index
    %28 = vector.load %arg3[%c0_16, %c0_17] : memref<8x4xf32, #tpu.memory_space<vmem>>, vector<8x4xf32>
    tpu.vector_store %arg3[%c0_16, %c0_17], %27 {strides = array<i32>} : memref<8x4xf32, #tpu.memory_space<vmem>>, vector<8x4xf32>,
    return
  }
  func.func @transform_0(%arg0: i32) -> (i32, i32) {
    %c0_i32 = arith.constant 0 : i32
    %c0_i32_0 = arith.constant 0 : i32
    return %arg0, %c0_i32 : i32, i32
  }
  func.func @transform_1(%arg0: i32) -> (i32, i32) {
    %c0_i32 = arith.constant 0 : i32
    %c0_i32_0 = arith.constant 0 : i32
    %c0_i32_1 = arith.constant 0 : i32
    return %c0_i32, %c0_i32_0 : i32, i32
  }
  func.func @transform_2(%arg0: i32) -> (i32, i32) {
    %c0_i32 = arith.constant 0 : i32
    %c0_i32_0 = arith.constant 0 : i32
    return %arg0, %c0_i32 : i32, i32
  }
}

</mosaic_0001>

<bundles_post_ra>
// kernel: tpu_custom_call.1
= control target key start
LH: loop header
LB: loop body
LE: loop exit
PB: predicated region body
PF: predicated region fallthrough
CT: control target
= control target key end

     0   :  { %vm19_vm0 = vcmask 1041408   ;;  %vm15_vm1 = vcmask 15360   ;;  %vm49_vm2 = vcmask 195584   ;;  %vm131_vm3 = vcmask 31744   ;;  %s212_s1 = inlined_call_operand.vmem [shape: f32[88,24], index: 1, kind: input, shape index: {}]   ;;  %s213_s0 = inlined_call_operand.vmem [shape: f32[8,2], index: 0, kind: input, shape index: {}]   ;;  %s214_s2 = inlined_call_operand.vmem [shape: f32[8,4], index: 2, kind: output, shape index: {}]  }
   0x1   :  { %v12_v0 = vld [vmem:[%s212_s1] sm:$0x3]  ;;  %v46_v2 = vld [vmem:[%s212_s1 + $0x18] sm:$0xff]  ;;  %v45_v3 = vld [vmem:[%s212_s1 + $0x10] sm:$0xff] }
   0x2   :  { %v11_v1 = vld [vmem:[%s213_s0] sm:$0xff]  ;;  %137 = vmatpush.msk.msra.mxu0 %vm19_vm0, %v12_v0  ;;  %66 = vmatpush.msra.mxu1 %v46_v2  ;;  %v44_v4 = vld [vmem:[%s212_s1 + $0x8] sm:$0xff]  ;;  %v76_v9 = vld [vmem:[%s212_s1 + $0x38] sm:$0xff] }
   0x3   :  { %138 = vmatmul.msk.f32.vlgmr.msra.gmra.mxu0 %vm15_vm1, %v11_v1  ;;  %v142_v5 = vld [vmem:[%s212_s1 + $0x2] ss:$0 sm:$0xff]  ;;  %95 = vmatpush.msra.mxu2 %v76_v9  ;;  %v75_v10 = vld [vmem:[%s212_s1 + $0x30] sm:$0xff]  ;;  %v74_v11 = vld [vmem:[%s212_s1 + $0x28] sm:$0xff] }
   0x4   :  { %67 = vmatpush.msra.mxu1 %v45_v3  ;;  %v143_v12 = vld [vmem:[%s212_s1 + $0x20] ss:$0 sm:$0xff]  ;;  %v105_v16 = vld [vmem:[%s212_s1 + $0x50] sm:$0xff]  ;;  %v104_v17 = vld [vmem:[%s212_s1 + $0x48] sm:$0xff] }
   0x5   :  { %96 = vmatpush.msra.mxu2 %v75_v10  ;;  %124 = vmatpush.msra.mxu3 %v105_v16  ;;  %v103_v18 = vld [vmem:[%s212_s1 + $0x40] sm:$0xff] }
   0x6   :  { %68 = vmatpush.msra.mxu1 %v44_v4  ;;  %v144_v19 = vld [vmem:[%s212_s1 + $0x21] ss:$0 sm:$0xff]  ;;  %v145_v23 = vld [vmem:[%s212_s1 + $0x22] ss:$0 sm:$0xff] }
   0x7   :  { %97 = vmatpush.msra.mxu2 %v74_v11  ;;  %125 = vmatpush.msra.mxu3 %v104_v17 }
   0x9   :  { %126 = vmatpush.msra.mxu3 %v103_v18 }
  0x80   :  { %v40_v6 = vpop.f32.mrf.mxu0 }
  0x81   :  { %v41_v7 = vadd.f32 %v142_v5, %v40_v6 }
  0x83   :  { %v43_v8 = vmax.f32 %v41_v7, 0.0 }
  0x85   :  { %139 = vmatmul.msk.f32.vlgmr.msra.gmra.mxu1 %vm49_vm2, %v43_v8 }
 0x102   :  { %v70_v13 = vpop.f32.mrf.mxu1 }
 0x103   :  { %v71_v14 = vadd.f32 %v143_v12, %v70_v13 }
 0x105   :  { %v73_v15 = vmax.f32 %v71_v14, 0.0 }
 0x107   :  { %140 = vmatmul.msk.f32.vlgmr.msra.gmra.mxu2 %vm49_vm2, %v73_v15 }
 0x18a   :  { %v99_v20 = vpop.f32.mrf.mxu2 }
 0x18b   :  { %v100_v21 = vadd.f32 %v144_v19, %v99_v20 }
 0x18d   :  { %v102_v22 = vmax.f32 %v100_v21, 0.0 }
 0x18f   :  { %141 = vmatmul.msk.f32.vlgmr.msra.gmra.mxu3 %vm49_vm2, %v102_v22 }
 0x212   :  { %v128_v24 = vpop.f32.mrf.mxu3 }
 0x213   :  { %v129_v25 = vadd.f32 %v145_v23, %v128_v24 }
 0x215   :  { %132 = vst.msk [vmem:[%s214_s2] sm:$0xff] %vm131_vm3, %v129_v25 }

</bundles_post_ra>
